<compile_context>
chip_gen: v6e
topology: v6e:2x2x1
jax: 0.10.0
libtpu: 0.0.40
codegen_flags: <defaults>
</compile_context>

<pallas_src>
import jax
import jax.numpy as jnp
from jax.experimental import pallas as pl
from jax.experimental.pallas import tpu as pltpu

_EPS = 1e-5  # nn.LayerNorm default eps
_MIB = 1024 * 1024


def _cnn_ln_kernel(x_ref, g_ref, b_ref, o_ref):
    # x_ref: (bc_tile, F, tile_T). Normalize each (bc, :, t) column over F,
    # i.e. reduce over the sublane axis (axis=-2); T stays lane-dense.
    x = x_ref[...].astype(jnp.float32)
    mean = jnp.mean(x, axis=-2, keepdims=True)          # (bc_tile, 1, tile_T)
    xc = x - mean
    var = jnp.mean(xc * xc, axis=-2, keepdims=True)     # biased var (PyTorch LayerNorm)
    inv = jax.lax.rsqrt(var + _EPS)
    g = g_ref[...].astype(jnp.float32)                  # (1, F, 1)
    b = b_ref[...].astype(jnp.float32)                  # (1, F, 1)
    o_ref[...] = (xc * inv * g + b).astype(o_ref.dtype)


def _tpu_budget():
    """Generation-aware (block_bytes_target, vmem_limit_bytes, num_cores)."""
    vmem = None
    try:
        vmem = pltpu.get_tpu_info().vmem_capacity_bytes
    except Exception:
        pass
    kind = ""
    try:
        kind = jax.devices()[0].device_kind.lower()
    except Exception:
        pass

    if vmem is not None and vmem <= 80 * _MIB:
        # v7x-class: 64 MiB VMEM per TC, 2 TCs/chip, ~3.2 TB/s HBM.
        # 4 MiB blocks: 2x(in+out) double-buffer = 16 MiB + f32 temps << 48 MiB.
        return 4 * _MIB, 48 * _MIB, 2
    if "v6" in kind:
        # v6e: 128 MiB VMEM, 32 MiB scoped default -> raise the limit a bit.
        return 4 * _MIB, 64 * _MIB, 1
    # v5e / unknown: stay inside the 16 MiB scoped-VMEM default.
    return 2 * _MIB, None, 1


def _largest_divisor_leq(n, cap):
    cap = min(cap, n)
    if cap <= 1:
        return 1
    best = 1
    d = 1
    while d * d <= n:
        if n % d == 0:
            q = n // d
            if d <= cap and d > best:
                best = d
            if q <= cap and q > best:
                best = q
        d += 1
    return best


def _choose_tiles(bc, feat, t, itemsize, target, num_cores):
    """Pick (bc_tile, tile_t): ~`target`-byte blocks, lane-dense in T."""
    full_t_bytes = feat * t * itemsize

    if full_t_bytes <= target:
        # Full-T tiles (maximally contiguous HBM rows); only grow bc_tile.
        tile_t = t
        cap = max(1, target // full_t_bytes)
        if num_cores > 1:
            # Keep at least `num_cores` grid steps so every TC gets work.
            cap = min(cap, max(1, bc // num_cores))
        bc_tile = _largest_divisor_leq(bc, cap)
        return bc_tile, tile_t

    # T must be split: one bc slice per step, lane-dense tile_t.
    bc_tile = 1
    cap_t = max(1, target // (feat * itemsize))
    if t < 128:
        # Sub-128 lane width (only reachable for enormous F): masked stores.
        return bc_tile, t
    cap_t_128 = max(128, (cap_t // 128) * 128)
    # Prefer an exact multiple-of-128 divisor of T (no ragged tail) unless it
    # is much smaller than the cap; otherwise fixed lane-dense cdiv tile with
    # the ragged final T block masked on writeback.
    best_div = 0
    d = 128
    lim = min(cap_t_128, t)
    while d <= lim:
        if t % d == 0:
            best_div = d
        d += 128
    if best_div >= cap_t_128 // 2:
        tile_t = best_div
    else:
        tile_t = min(cap_t_128, t)
    return bc_tile, tile_t


@jax.jit
def cnn_layer_norm(x, gamma, beta):
    """Equivalent of CNNLayerNorm.forward.

    x: (B, C, n_feats, T) -> (B, C, n_feats, T); gamma, beta: (n_feats,).
    LayerNorm over the n_feats axis, computed in the native NCHW layout
    (no transposes, no extra HBM round-trips).
    """
    B, C, F, T = x.shape
    bc = B * C
    itemsize = jnp.dtype(x.dtype).itemsize
    x3 = x.reshape(bc, F, T)          # metadata-only merge of leading dims
    g3 = gamma.reshape(1, F, 1)
    b3 = beta.reshape(1, F, 1)

    target, vmem_limit, num_cores = _tpu_budget()
    bc_tile, tile_t = _choose_tiles(bc, F, T, itemsize, target, num_cores)
    grid = (pl.cdiv(bc, bc_tile), pl.cdiv(T, tile_t))

    cp_kwargs = dict(dimension_semantics=("parallel", "parallel"))
    if vmem_limit is not None:
        cp_kwargs["vmem_limit_bytes"] = int(vmem_limit)

    n_elems = bc * F * T
    cost = pl.CostEstimate(
        flops=9 * n_elems,                         # sub, sq, mul-adds, scale+shift
        transcendentals=bc * T,                    # one rsqrt per (bc, t) column
        bytes_accessed=2 * n_elems * itemsize + 2 * F * 4,
    )

    y3 = pl.pallas_call(
        _cnn_ln_kernel,
        out_shape=jax.ShapeDtypeStruct((bc, F, T), x.dtype),
        grid_spec=pltpu.PrefetchScalarGridSpec(
            num_scalar_prefetch=0,
            grid=grid,
            in_specs=[
                pl.BlockSpec((bc_tile, F, tile_t), lambda i, j: (i, 0, j)),
                pl.BlockSpec((1, F, 1), lambda i, j: (0, 0, 0)),
                pl.BlockSpec((1, F, 1), lambda i, j: (0, 0, 0)),
            ],
            out_specs=pl.BlockSpec((bc_tile, F, tile_t), lambda i, j: (i, 0, j)),
        ),
        compiler_params=pltpu.CompilerParams(**cp_kwargs),
        cost_estimate=cost,
    )(x3, g3, b3)
    return y3.reshape(B, C, F, T)


def _reference(x, gamma, beta):
    xf = x.astype(jnp.float32)
    mean = jnp.mean(xf, axis=2, keepdims=True)
    var = jnp.mean((xf - mean) ** 2, axis=2, keepdims=True)
    y = (xf - mean) * jax.lax.rsqrt(var + _EPS)
    y = y * gamma[None, None, :, None] + beta[None, None, :, None]
    return y.astype(x.dtype)


if __name__ == "__main__":
    key = jax.random.PRNGKey(0)
    k1, k2, k3 = jax.random.split(key, 3)

    B, C, n_feats, T = 2, 4, 16, 16
    x = jax.random.normal(k1, (B, C, n_feats, T), dtype=jnp.float32)
    # nn.LayerNorm(n_feats) default params: weight=ones, bias=zeros.
    gamma = jnp.ones((n_feats,), dtype=jnp.float32)
    beta = jnp.zeros((n_feats,), dtype=jnp.float32)

    out = jax.block_until_ready(cnn_layer_norm(x, gamma, beta))
    ref = _reference(x, gamma, beta)
    assert out.shape == (B, C, n_feats, T)
    assert float(jnp.max(jnp.abs(out - ref))) < 1e-4

    # Lane-dense (T % 128 == 0) path with non-trivial gamma/beta.
    gamma2 = jax.random.normal(k3, (n_feats,), dtype=jnp.float32)
    beta2 = jax.random.normal(k2, (n_feats,), dtype=jnp.float32) * 0.1
    x2 = jax.random.normal(k2, (B, C, n_feats, 256), dtype=jnp.float32)
    out2 = jax.block_until_ready(cnn_layer_norm(x2, gamma2, beta2))
    ref2 = _reference(x2, gamma2, beta2)
    assert out2.shape == (B, C, n_feats, 256)
    assert float(jnp.max(jnp.abs(out2 - ref2))) < 1e-4

    print("KERNEL_OK")
</pallas_src>

<mosaic_0001>
module attributes {stable_mosaic.version = 11 : i64} {
  func.func @_cnn_ln_kernel(%arg0: i32, %arg1: i32, %arg2: memref<8x16x16xf32, #tpu.memory_space<vmem>>, %arg3: memref<1x16x1xf32, #tpu.memory_space<vmem>>, %arg4: memref<1x16x1xf32, #tpu.memory_space<vmem>>, %arg5: memref<8x16x16xf32, #tpu.memory_space<vmem>>) attributes {dimension_semantics = [#tpu.dimension_semantics<parallel>, #tpu.dimension_semantics<parallel>], iteration_bounds = array<i64: 1, 1>, scalar_prefetch = 0 : i64, scratch_operands = 0 : i64, tpu.core_type = #tpu.core_type<tc>, window_params = [{transform_indices = @transform_0, window_bounds = array<i64: 8, 16, 16>}, {pipeline_mode = #tpu.pipeline_mode<synchronous>, transform_indices = @transform_1, window_bounds = array<i64: 1, 16, 1>}, {pipeline_mode = #tpu.pipeline_mode<synchronous>, transform_indices = @transform_2, window_bounds = array<i64: 1, 16, 1>}, {transform_indices = @transform_3, window_bounds = array<i64: 8, 16, 16>}]} {
    %c0 = arith.constant 0 : index
    %c0_0 = arith.constant 0 : index
    %c0_1 = arith.constant 0 : index
    %0 = vector.load %arg2[%c0, %c0_0, %c0_1] : memref<8x16x16xf32, #tpu.memory_space<vmem>>, vector<8x16x16xf32>
    %cst = arith.constant dense<0.000000e+00> : vector<8x16xf32>
    %1 = vector.multi_reduction <add>, %0, %cst [1] : vector<8x16x16xf32> to vector<8x16xf32>
    %2 = vector.shape_cast %1 : vector<8x16xf32> to vector<8x1x16xf32>
    %cst_2 = arith.constant 1.600000e+01 : f32
    %3 = vector.broadcast %cst_2 : f32 to vector<8x1x16xf32>
    %4 = arith.divf %2, %3 : vector<8x1x16xf32>
    %5 = vector.broadcast %4 : vector<8x1x16xf32> to vector<8x16x16xf32>
    %6 = arith.subf %0, %5 : vector<8x16x16xf32>
    %7 = arith.mulf %6, %6 : vector<8x16x16xf32>
    %cst_3 = arith.constant dense<0.000000e+00> : vector<8x16xf32>
    %8 = vector.multi_reduction <add>, %7, %cst_3 [1] : vector<8x16x16xf32> to vector<8x16xf32>
    %9 = vector.shape_cast %8 : vector<8x16xf32> to vector<8x1x16xf32>
    %cst_4 = arith.constant 1.600000e+01 : f32
    %10 = vector.broadcast %cst_4 : f32 to vector<8x1x16xf32>
    %11 = arith.divf %9, %10 : vector<8x1x16xf32>
    %cst_5 = arith.constant 9.99999974E-6 : f32
    %12 = vector.broadcast %cst_5 : f32 to vector<8x1x16xf32>
    %13 = arith.addf %11, %12 : vector<8x1x16xf32>
    %14 = math.rsqrt %13 : vector<8x1x16xf32>
    %c0_6 = arith.constant 0 : index
    %c0_7 = arith.constant 0 : index
    %c0_8 = arith.constant 0 : index
    %15 = vector.load %arg3[%c0_6, %c0_7, %c0_8] : memref<1x16x1xf32, #tpu.memory_space<vmem>>, vector<1x16x1xf32>
    %c0_9 = arith.constant 0 : index
    %c0_10 = arith.constant 0 : index
    %c0_11 = arith.constant 0 : index
    %16 = vector.load %arg4[%c0_9, %c0_10, %c0_11] : memref<1x16x1xf32, #tpu.memory_space<vmem>>, vector<1x16x1xf32>
    %17 = vector.broadcast %14 : vector<8x1x16xf32> to vector<8x16x16xf32>
    %18 = arith.mulf %6, %17 : vector<8x16x16xf32>
    %19 = vector.broadcast %15 : vector<1x16x1xf32> to vector<8x16x16xf32>
    %20 = arith.mulf %18, %19 : vector<8x16x16xf32>
    %21 = vector.broadcast %16 : vector<1x16x1xf32> to vector<8x16x16xf32>
    %22 = arith.addf %20, %21 : vector<8x16x16xf32>
    %c0_12 = arith.constant 0 : index
    %c0_13 = arith.constant 0 : index
    %c0_14 = arith.constant 0 : index
    %23 = vector.load %arg5[%c0_12, %c0_13, %c0_14] : memref<8x16x16xf32, #tpu.memory_space<vmem>>, vector<8x16x16xf32>
    tpu.vector_store %arg5[%c0_12, %c0_13, %c0_14], %22 {strides = array<i32>} : memref<8x16x16xf32, #tpu.memory_space<vmem>>, vector<8x16x16xf32>,
    return
  }
  func.func @transform_0(%arg0: i32, %arg1: i32) -> (i32, i32, i32) {
    %c0_i32 = arith.constant 0 : i32
    %c0_i32_0 = arith.constant 0 : i32
    return %arg0, %c0_i32, %arg1 : i32, i32, i32
  }
  func.func @transform_1(%arg0: i32, %arg1: i32) -> (i32, i32, i32) {
    %c0_i32 = arith.constant 0 : i32
    %c0_i32_0 = arith.constant 0 : i32
    %c0_i32_1 = arith.constant 0 : i32
    %c0_i32_2 = arith.constant 0 : i32
    return %c0_i32, %c0_i32_0, %c0_i32_1 : i32, i32, i32
  }
  func.func @transform_2(%arg0: i32, %arg1: i32) -> (i32, i32, i32) {
    %c0_i32 = arith.constant 0 : i32
    %c0_i32_0 = arith.constant 0 : i32
    %c0_i32_1 = arith.constant 0 : i32
    %c0_i32_2 = arith.constant 0 : i32
    return %c0_i32, %c0_i32_0, %c0_i32_1 : i32, i32, i32
  }
  func.func @transform_3(%arg0: i32, %arg1: i32) -> (i32, i32, i32) {
    %c0_i32 = arith.constant 0 : i32
    %c0_i32_0 = arith.constant 0 : i32
    return %arg0, %c0_i32, %arg1 : i32, i32, i32
  }
}

</mosaic_0001>

<bundles_post_ra>
// kernel: cnn_layer_norm.1
= control target key start
LH: loop header
LB: loop body
LE: loop exit
PB: predicated region body
PF: predicated region fallthrough
CT: control target
= control target key end

     0   :  { %8 = vsyncpa [#allocation3], 0  ;;  %s668_s0 = inlined_call_operand.hbm [shape: f32[8,16,16], index: 0, kind: input, shape index: {}]   ;;  %s669_s1 = inlined_call_operand.vmem [shape: f32[1,16,1], index: 1, kind: input, shape index: {}]   ;;  %s670_s2 = inlined_call_operand.vmem [shape: f32[1,16,1], index: 2, kind: input, shape index: {}]   ;;  %s671_s3 = inlined_call_operand.hbm [shape: f32[8,16,16], index: 3, kind: output, shape index: {}]  }
   0x1   :  { %9 = vsyncpa [#allocation4], 0  ;;  %s427_s12 = smov [#allocation2]  }
   0x2   :  { %s15_s13 = sshll.u32 %s427_s12, 4  ;;  %s16_s13 = int_to_ptr.vmem [resolvable:$true] %s15_s13 }
   0x3   :  { %s391_s14 = scalar_lea.vmem %s16_s13, 2048  ;;  %p396_p1 = scmp.lt.s32.totalorder %s16_s13, %s16_s13 }
   0x4   :  { %p392_p0 = scmp.ne.s32.totalorder %s16_s13, %s391_s14  ;;  %p397_p2 = scmp.lt.s32.totalorder %s391_s14, %s391_s14 }
   0x6   :  { %p398_p3 = por %p397_p2, %p396_p1 }
   0x8   :  { %p399_p4 = pnand %p398_p3, %p392_p0 }
   0xa   :  { %402 = shalt.err (!%p399_p4)
}
   0xb   :  { %s428_s15 = smov 128   ;;  %s429_s16 = smov 8  }
   0xc   :  { %21 = dma.hbm_to_vmem [thread:$0]  %s668_s0, 2048, %s16_s13, [#allocation3], %s428_s15, %s428_s15, %s429_s16  }
   0xd   :  { %423 = dma.done.wait [#allocation3], 2048  }
   0xe   :  { %424 = vsyncadd [#allocation3], 4294965248  ;;  %v430_v0 = vmov 0   ;;  %v257_v1 = vld [vmem:[%s670_s2] sm:$0xff]  ;;  %v258_v3 = vld [vmem:[%s670_s2 + $0x8] sm:$0xff]  ;;  %vm45_vm0 = vcmask 130048  }
   0xf   :  { %366 = vset.pattern.permute.xlu1 %v430_v0  ;;  %365 = vset.pattern.permute.xlu0 %v430_v0  ;;  %v255_v2 = vld [vmem:[%s669_s1] sm:$0xff]  ;;  %v256_v4 = vld [vmem:[%s669_s1 + $0x8] sm:$0xff]  ;;  %v474_v7 = vld [vmem:[#allocation2 + $0x10] sm:$0xff]  ;;  %s431_s1 = smov [#allocation5]  }
  0x10   :  { %303 = vperm.xlu1 %366, %v257_v1   ;;  %277 = vperm.xlu0 %365, %v255_v2   ;;  %v470_v5 = vld [vmem:[#allocation2] sm:$0xff]  ;;  %v472_v6 = vld [vmem:[#allocation2 + $0x8] sm:$0xff]  ;;  %v476_v8 = vld [vmem:[#allocation2 + $0x18] sm:$0xff]  ;;  %v55_v16 = vsel %vm45_vm0, %v474_v7, 0.0  ;;  %s348_s2 = sshll.u32 %s431_s1, 4  ;;  %s349_s2 = int_to_ptr.vmem [resolvable:$true] %s348_s2 }
  0x11   :  { %v478_v9 = vld [vmem:[#allocation2 + $0x20] sm:$0xff]  ;;  %v46_v10 = vsel %vm45_vm0, %v470_v5, 0.0  ;;  %v47_v11 = vsel %vm45_vm0, %v472_v6, 0.0  ;;  %v484_v12 = vld [vmem:[#allocation2 + $0x28] sm:$0xff]  ;;  %v486_v13 = vld [vmem:[#allocation2 + $0x30] sm:$0xff]  ;;  %v56_v17 = vsel %vm45_vm0, %v476_v8, 0.0  ;;  %p408_p6 = scmp.lt.s32.totalorder %s349_s2, %s349_s2 }
  0x12   :  { %v488_v14 = vld [vmem:[#allocation2 + $0x38] sm:$0xff]  ;;  %v490_v15 = vld [vmem:[#allocation2 + $0x40] sm:$0xff]  ;;  %v496_v18 = vld [vmem:[#allocation2 + $0x48] sm:$0xff]  ;;  %v48_v21 = vadd.f32 %v47_v11, %v46_v10  ;;  %v64_v24 = vsel %vm45_vm0, %v478_v9, 0.0  ;;  %v65_v25 = vsel %vm45_vm0, %v484_v12, 0.0  ;;  %v73_v26 = vsel %vm45_vm0, %v486_v13, 0.0 }
  0x13   :  { %v498_v19 = vld [vmem:[#allocation2 + $0x50] sm:$0xff]  ;;  %v500_v20 = vld [vmem:[#allocation2 + $0x58] sm:$0xff]  ;;  %v502_v22 = vld [vmem:[#allocation2 + $0x60] sm:$0xff]  ;;  %v74_v27 = vsel %vm45_vm0, %v488_v14, 0.0  ;;  %v57_v28 = vadd.f32 %v56_v17, %v55_v16  ;;  %v82_v31 = vsel %vm45_vm0, %v490_v15, 0.0  ;;  %v83_v32 = vsel %vm45_vm0, %v496_v18, 0.0 }
  0x14   :  { %308 = vperm.xlu1 %366, %v258_v3   ;;  %282 = vperm.xlu0 %365, %v256_v4   ;;  %v504_v23 = vld [vmem:[#allocation2 + $0x68] sm:$0xff]  ;;  %v514_v29 = vld [vmem:[#allocation2 + $0x70] sm:$0xff]  ;;  %v516_v30 = vld [vmem:[#allocation2 + $0x78] sm:$0xff]  ;;  %v91_v33 = vsel %vm45_vm0, %v498_v19, 0.0  ;;  %v92_v34 = vsel %vm45_vm0, %v500_v20, 0.0  ;;  %v66_v35 = vadd.f32 %v65_v25, %v64_v24  ;;  %v75_v36 = vadd.f32 %v74_v27, %v73_v26  ;;  %s403_s26 = scalar_lea.vmem %s349_s2, 2048 }
  0x15   :  { %v100_v37 = vsel %vm45_vm0, %v502_v22, 0.0  ;;  %v101_v38 = vsel %vm45_vm0, %v504_v23, 0.0  ;;  %v49_v39 = vrot.slane %v48_v21, 4  ;;  %v84_v40 = vadd.f32 %v83_v32, %v82_v31  ;;  %p404_p5 = scmp.ne.s32.totalorder %s349_s2, %s403_s26  ;;  %p409_p7 = scmp.lt.s32.totalorder %s403_s26, %s403_s26 }
  0x16   :  { %v93_v41 = vadd.f32 %v92_v34, %v91_v33  ;;  %v109_v42 = vsel %vm45_vm0, %v514_v29, 0.0  ;;  %v110_v43 = vsel %vm45_vm0, %v516_v30, 0.0  ;;  %v58_v44 = vrot.slane %v57_v28, 4 }
  0x17   :  { %v102_v45 = vadd.f32 %v101_v38, %v100_v37  ;;  %v67_v46 = vrot.slane %v66_v35, 4  ;;  %v76_v47 = vrot.slane %v75_v36, 4  ;;  %v50_v48 = vadd.f32 %v49_v39, %v48_v21  ;;  %p410_p8 = por %p409_p7, %p408_p6 }
  0x18   :  { %v111_v49 = vadd.f32 %v110_v43, %v109_v42  ;;  %v85_v50 = vrot.slane %v84_v40, 4  ;;  %v94_v51 = vrot.slane %v93_v41, 4  ;;  %v59_v52 = vadd.f32 %v58_v44, %v57_v28 }
  0x19   :  { %v103_v53 = vrot.slane %v102_v45, 4  ;;  %v68_v54 = vadd.f32 %v67_v46, %v66_v35  ;;  %v77_v55 = vadd.f32 %v76_v47, %v75_v36  ;;  %v51_v56 = vrot.slane %v50_v48, 2  ;;  %p411_p9 = pnand %p410_p8, %p404_p5 }
  0x1a   :  { %v112_v57 = vrot.slane %v111_v49, 4  ;;  %v86_v58 = vadd.f32 %v85_v50, %v84_v40  ;;  %v95_v59 = vadd.f32 %v94_v51, %v93_v41  ;;  %v60_v60 = vrot.slane %v59_v52, 2 }
  0x1b   :  { %v104_v61 = vadd.f32 %v103_v53, %v102_v45  ;;  %v69_v62 = vrot.slane %v68_v54, 2  ;;  %v78_v63 = vrot.slane %v77_v55, 2  ;;  %v52_v0 = vadd.f32 %v51_v56, %v50_v48 }
  0x1c   :  { %v113_v1 = vadd.f32 %v112_v57, %v111_v49  ;;  %v87_v2 = vrot.slane %v86_v58, 2  ;;  %v96_v3 = vrot.slane %v95_v59, 2  ;;  %v61_v4 = vadd.f32 %v60_v60, %v59_v52 }
  0x1d   :  { %v105_v10 = vrot.slane %v104_v61, 2  ;;  %v70_v11 = vadd.f32 %v69_v62, %v68_v54  ;;  %v79_v16 = vadd.f32 %v78_v63, %v77_v55  ;;  %v53_v17 = vrot.slane %v52_v0, 1 }
  0x1e   :  { %v114_v21 = vrot.slane %v113_v1, 2  ;;  %v88_v24 = vadd.f32 %v87_v2, %v86_v58  ;;  %v97_v25 = vadd.f32 %v96_v3, %v95_v59  ;;  %v62_v26 = vrot.slane %v61_v4, 1 }
  0x1f   :  { %v106_v27 = vadd.f32 %v105_v10, %v104_v61  ;;  %v71_v28 = vrot.slane %v70_v11, 1  ;;  %v80_v31 = vrot.slane %v79_v16, 1  ;;  %v54_v32 = vadd.f32 %v53_v17, %v52_v0 }
  0x20   :  { %v115_v33 = vadd.f32 %v114_v21, %v113_v1  ;;  %v89_v34 = vrot.slane %v88_v24, 1  ;;  %v98_v35 = vrot.slane %v97_v25, 1  ;;  %v63_v36 = vadd.f32 %v62_v26, %v61_v4 }
  0x21   :  { %v107_v37 = vrot.slane %v106_v27, 1  ;;  %v72_v38 = vadd.f32 %v71_v28, %v70_v11  ;;  %v81_v39 = vadd.f32 %v80_v31, %v79_v16  ;;  %v119_v41 = vmul.f32 0.0625, %v54_v32 }
  0x22   :  { %v116_v40 = vrot.slane %v115_v33, 1  ;;  %v90_v42 = vadd.f32 %v89_v34, %v88_v24  ;;  %v99_v43 = vadd.f32 %v98_v35, %v97_v25  ;;  %v120_v45 = vmul.f32 0.0625, %v63_v36 }
  0x23   :  { %v108_v44 = vadd.f32 %v107_v37, %v106_v27  ;;  %v121_v46 = vmul.f32 0.0625, %v72_v38  ;;  %v122_v47 = vmul.f32 0.0625, %v81_v39  ;;  %v535_v49 = vsub.f32 %v470_v5, %v119_v41 }
  0x24   :  { %v117_v48 = vadd.f32 %v116_v40, %v115_v33  ;;  %v538_v50 = vsub.f32 %v472_v6, %v119_v41  ;;  %v123_v51 = vmul.f32 0.0625, %v90_v42  ;;  %v124_v52 = vmul.f32 0.0625, %v99_v43 }
  0x25   :  { %v125_v53 = vmul.f32 0.0625, %v108_v44  ;;  %v541_v54 = vsub.f32 %v474_v7, %v120_v45  ;;  %v544_v55 = vsub.f32 %v476_v8, %v120_v45  ;;  %v547_v56 = vsub.f32 %v478_v9, %v121_v46 }
  0x26   :  { %v550_v57 = vsub.f32 %v484_v12, %v121_v46  ;;  %v553_v5 = vsub.f32 %v486_v13, %v122_v47  ;;  %v556_v6 = vsub.f32 %v488_v14, %v122_v47  ;;  %v126_v58 = vmul.f32 0.0625, %v117_v48 }
  0x27   :  { %v143_v7 = vmul.f32 %v535_v49, %v535_v49  ;;  %v144_v8 = vmul.f32 %v538_v50, %v538_v50  ;;  %v563_v59 = vsub.f32 %v490_v15, %v123_v51  ;;  %v566_v9 = vsub.f32 %v496_v18, %v123_v51 }
  0x28   :  { %v569_v12 = vsub.f32 %v498_v19, %v124_v52  ;;  %v572_v13 = vsub.f32 %v500_v20, %v124_v52  ;;  %v575_v14 = vsub.f32 %v502_v22, %v125_v53  ;;  %v578_v60 = vsub.f32 %v504_v23, %v125_v53 }
  0x29   :  { %v145_v61 = vmul.f32 %v541_v54, %v541_v54  ;;  %v146_v15 = vmul.f32 %v544_v55, %v544_v55  ;;  %v147_v18 = vmul.f32 %v547_v56, %v547_v56  ;;  %v148_v19 = vmul.f32 %v550_v57, %v550_v57 }
  0x2a   :  { %v149_v20 = vmul.f32 %v553_v5, %v553_v5  ;;  %v150_v22 = vmul.f32 %v556_v6, %v556_v6  ;;  %v593_v23 = vsub.f32 %v514_v29, %v126_v58  ;;  %v596_v62 = vsub.f32 %v516_v30, %v126_v58 }
  0x2b   :  { %v159_v63 = vsel %vm45_vm0, %v143_v7, 0.0  ;;  %v160_v0 = vsel %vm45_vm0, %v144_v8, 0.0  ;;  %v151_v1 = vmul.f32 %v563_v59, %v563_v59  ;;  %v152_v2 = vmul.f32 %v566_v9, %v566_v9 }
  0x2c   :  { %v153_v3 = vmul.f32 %v569_v12, %v569_v12  ;;  %v154_v29 = vmul.f32 %v572_v13, %v572_v13  ;;  %v155_v30 = vmul.f32 %v575_v14, %v575_v14  ;;  %v168_v4 = vsel %vm45_vm0, %v145_v61, 0.0 }
  0x2d   :  { %v169_v10 = vsel %vm45_vm0, %v146_v15, 0.0  ;;  %v156_v11 = vmul.f32 %v578_v60, %v578_v60  ;;  %v161_v16 = vadd.f32 %v160_v0, %v159_v63  ;;  %v177_v17 = vsel %vm45_vm0, %v147_v18, 0.0 }
  0x2e   :  { %v178_v21 = vsel %vm45_vm0, %v148_v19, 0.0  ;;  %v157_v24 = vmul.f32 %v593_v23, %v593_v23  ;;  %v158_v25 = vmul.f32 %v596_v62, %v596_v62  ;;  %v186_v26 = vsel %vm45_vm0, %v149_v20, 0.0 }
  0x2f   :  { %v187_v27 = vsel %vm45_vm0, %v150_v22, 0.0  ;;  %v170_v28 = vadd.f32 %v169_v10, %v168_v4  ;;  %v195_v31 = vsel %vm45_vm0, %v151_v1, 0.0  ;;  %v196_v32 = vsel %vm45_vm0, %v152_v2, 0.0 }
  0x30   :  { %v179_v33 = vadd.f32 %v178_v21, %v177_v17  ;;  %v204_v34 = vsel %vm45_vm0, %v153_v3, 0.0  ;;  %v205_v35 = vsel %vm45_vm0, %v154_v29, 0.0  ;;  %v188_v36 = vadd.f32 %v187_v27, %v186_v26 }
  0x31   :  { %v213_v37 = vsel %vm45_vm0, %v155_v30, 0.0  ;;  %v214_v38 = vsel %vm45_vm0, %v156_v11, 0.0  ;;  %v162_v39 = vrot.slane %v161_v16, 4  ;;  %v197_v40 = vadd.f32 %v196_v32, %v195_v31 }
  0x32   :  { %v222_v41 = vsel %vm45_vm0, %v157_v24, 0.0  ;;  %v223_v42 = vsel %vm45_vm0, %v158_v25, 0.0  ;;  %v171_v43 = vrot.slane %v170_v28, 4  ;;  %v206_v44 = vadd.f32 %v205_v35, %v204_v34 }
  0x33   :  { %v180_v45 = vrot.slane %v179_v33, 4  ;;  %v215_v46 = vadd.f32 %v214_v38, %v213_v37  ;;  %v189_v47 = vrot.slane %v188_v36, 4  ;;  %v224_v48 = vadd.f32 %v223_v42, %v222_v41 }
  0x34   :  { %v163_v51 = vadd.f32 %v162_v39, %v161_v16  ;;  %v198_v52 = vrot.slane %v197_v40, 4  ;;  %v172_v53 = vadd.f32 %v171_v43, %v170_v28  ;;  %v207_v58 = vrot.slane %v206_v44, 4 }
  0x35   :  { %v181_v7 = vadd.f32 %v180_v45, %v179_v33  ;;  %v216_v8 = vrot.slane %v215_v46, 4  ;;  %v190_v61 = vadd.f32 %v189_v47, %v188_v36  ;;  %v225_v15 = vrot.slane %v224_v48, 4 }
  0x36   :  { %v164_v18 = vrot.slane %v163_v51, 2  ;;  %v199_v19 = vadd.f32 %v198_v52, %v197_v40  ;;  %v173_v20 = vrot.slane %v172_v53, 2  ;;  %v208_v22 = vadd.f32 %v207_v58, %v206_v44 }
  0x37   :  { %v182_v63 = vrot.slane %v181_v7, 2  ;;  %v217_v0 = vadd.f32 %v216_v8, %v215_v46  ;;  %v191_v1 = vrot.slane %v190_v61, 2  ;;  %v226_v2 = vadd.f32 %v225_v15, %v224_v48 }
  0x38   :  { %v165_v3 = vadd.f32 %v164_v18, %v163_v51  ;;  %v200_v29 = vrot.slane %v199_v19, 2  ;;  %v174_v30 = vadd.f32 %v173_v20, %v172_v53  ;;  %v209_v4 = vrot.slane %v208_v22, 2 }
  0x39   :  { %v183_v10 = vadd.f32 %v182_v63, %v181_v7  ;;  %v218_v11 = vrot.slane %v217_v0, 2  ;;  %v192_v16 = vadd.f32 %v191_v1, %v190_v61  ;;  %v227_v17 = vrot.slane %v226_v2, 2 }
  0x3a   :  { %v166_v21 = vrot.slane %v165_v3, 1  ;;  %v201_v24 = vadd.f32 %v200_v29, %v199_v19  ;;  %v175_v25 = vrot.slane %v174_v30, 1  ;;  %v210_v26 = vadd.f32 %v209_v4, %v208_v22 }
  0x3b   :  { %v184_v27 = vrot.slane %v183_v10, 1  ;;  %v219_v28 = vadd.f32 %v218_v11, %v217_v0  ;;  %v193_v31 = vrot.slane %v192_v16, 1  ;;  %v228_v32 = vadd.f32 %v227_v17, %v226_v2 }
  0x3c   :  { %v167_v33 = vadd.f32 %v166_v21, %v165_v3  ;;  %v202_v34 = vrot.slane %v201_v24, 1  ;;  %v176_v35 = vadd.f32 %v175_v25, %v174_v30  ;;  %v211_v36 = vrot.slane %v210_v26, 1 }
  0x3d   :  { %v185_v37 = vadd.f32 %v184_v27, %v183_v10  ;;  %v220_v38 = vrot.slane %v219_v28, 1  ;;  %v194_v39 = vadd.f32 %v193_v31, %v192_v16  ;;  %v229_v40 = vrot.slane %v228_v32, 1 }
  0x3e   :  { %v203_v41 = vadd.f32 %v202_v34, %v201_v24  ;;  %v231_v42 = vmul.f32 0.0625, %v167_v33  ;;  %v212_v43 = vadd.f32 %v211_v36, %v210_v26  ;;  %v232_v44 = vmul.f32 0.0625, %v176_v35 }
  0x3f   :  { %v221_v45 = vadd.f32 %v220_v38, %v219_v28  ;;  %v233_v46 = vmul.f32 0.0625, %v185_v37  ;;  %v230_v47 = vadd.f32 %v229_v40, %v228_v32  ;;  %v234_v48 = vmul.f32 0.0625, %v194_v39 }
  0x40   :  { %v235_v51 = vmul.f32 0.0625, %v203_v41  ;;  %v239_v52 = vadd.f32 1e-05, %v231_v42  ;;  %v236_v53 = vmul.f32 0.0625, %v212_v43  ;;  %v240_v58 = vadd.f32 1e-05, %v232_v44 }
  0x41   :  { %v237_v7 = vmul.f32 0.0625, %v221_v45  ;;  %v241_v8 = vadd.f32 1e-05, %v233_v46  ;;  %v238_v61 = vmul.f32 0.0625, %v230_v47  ;;  %v242_v15 = vadd.f32 1e-05, %v234_v48 }
  0x42   :  { %v243_v18 = vadd.f32 1e-05, %v235_v51  ;;  %367 = vrsqrt.f32 %v239_v52  ;;  %v244_v19 = vadd.f32 1e-05, %v236_v53 }
  0x43   :  { %369 = vrsqrt.f32 %v240_v58  ;;  %v245_v20 = vadd.f32 1e-05, %v237_v7  ;;  %v246_v22 = vadd.f32 1e-05, %v238_v61 }
  0x44   :  { %371 = vrsqrt.f32 %v241_v8 }
  0x45   :  { %373 = vrsqrt.f32 %v242_v15 }
  0x46   :  { %375 = vrsqrt.f32 %v243_v18 }
  0x47   :  { %377 = vrsqrt.f32 %v244_v19 }
  0x48   :  { %379 = vrsqrt.f32 %v245_v20 }
  0x49   :  { %381 = vrsqrt.f32 %v246_v22 }
  0x4f   :  { %v368_v63 = vpop.eup %367 }
  0x50   :  { %v370_v0 = vpop.eup %369  ;;  %v259_v10 = vmul.f32 %v368_v63, %v535_v49  ;;  %v260_v27 = vmul.f32 %v368_v63, %v538_v50 }
  0x51   :  { %v372_v1 = vpop.eup %371  ;;  %v261_v11 = vmul.f32 %v370_v0, %v541_v54  ;;  %v262_v28 = vmul.f32 %v370_v0, %v544_v55 }
  0x52   :  { %v374_v2 = vpop.eup %373  ;;  %v263_v16 = vmul.f32 %v372_v1, %v547_v56  ;;  %v264_v49 = vmul.f32 %v372_v1, %v550_v57 }
  0x53   :  { %v376_v3 = vpop.eup %375  ;;  %v265_v17 = vmul.f32 %v374_v2, %v553_v5  ;;  %v266_v54 = vmul.f32 %v374_v2, %v556_v6 }
  0x54   :  { %v378_v29 = vpop.eup %377  ;;  %v267_v21 = vmul.f32 %v376_v3, %v563_v59  ;;  %v268_v5 = vmul.f32 %v376_v3, %v566_v9 }
  0x55   :  { %v380_v30 = vpop.eup %379  ;;  %v269_v24 = vmul.f32 %v378_v29, %v569_v12  ;;  %v270_v59 = vmul.f32 %v378_v29, %v572_v13 }
  0x56   :  { %v382_v4 = vpop.eup %381  ;;  %v271_v25 = vmul.f32 %v380_v30, %v575_v14  ;;  %v272_v12 = vmul.f32 %v380_v30, %v578_v60 }
  0x57   :  { %v273_v26 = vmul.f32 %v382_v4, %v593_v23  ;;  %v274_v14 = vmul.f32 %v382_v4, %v596_v62 }
  0x8b   :  { %v304_v31 = vpop.permute.xlu1 %303  ;;  %v278_v56 = vpop.permute.xlu0 %277 }
  0x8c   :  { %v285_v32 = vmul.f32 %v278_v56, %v259_v10  ;;  %v287_v23 = vmul.f32 %v278_v56, %v261_v11  ;;  %v289_v33 = vmul.f32 %v278_v56, %v263_v16  ;;  %v291_v50 = vmul.f32 %v278_v56, %v265_v17 }
  0x8d   :  { %v293_v34 = vmul.f32 %v278_v56, %v267_v21  ;;  %v295_v55 = vmul.f32 %v278_v56, %v269_v24  ;;  %v297_v35 = vmul.f32 %v278_v56, %v271_v25  ;;  %v299_v57 = vmul.f32 %v278_v56, %v273_v26 }
  0x8e   :  { %v311_v36 = vadd.f32 %v304_v31, %v285_v32  ;;  %v313_v6 = vadd.f32 %v304_v31, %v287_v23  ;;  %v315_v37 = vadd.f32 %v304_v31, %v289_v33  ;;  %v317_v38 = vadd.f32 %v304_v31, %v291_v50 }
  0x8f   :  { %v283_v39 = vpop.permute.xlu0 %282  ;;  %v319_v9 = vadd.f32 %v304_v31, %v293_v34  ;;  %v321_v40 = vadd.f32 %v304_v31, %v295_v55  ;;  %v323_v13 = vadd.f32 %v304_v31, %v297_v35  ;;  %v325_v41 = vadd.f32 %v304_v31, %v299_v57  ;;  %v309_v44 = vpop.permute.xlu1 %308 }
  0x90   :  { %v286_v60 = vmul.f32 %v283_v39, %v260_v27  ;;  %v288_v42 = vmul.f32 %v283_v39, %v262_v28  ;;  %v290_v62 = vmul.f32 %v283_v39, %v264_v49  ;;  %v292_v43 = vmul.f32 %v283_v39, %v266_v54  ;;  %327 = vst.msk [vmem:[#allocation5] sm:$0xff] %vm45_vm0, %v311_v36 }
  0x91   :  { %329 = vst.msk [vmem:[#allocation5 + $0x10] sm:$0xff] %vm45_vm0, %v313_v6  ;;  %331 = vst.msk [vmem:[#allocation5 + $0x20] sm:$0xff] %vm45_vm0, %v315_v37  ;;  %v294_v45 = vmul.f32 %v283_v39, %v268_v5  ;;  %v296_v46 = vmul.f32 %v283_v39, %v270_v59  ;;  %v298_v47 = vmul.f32 %v283_v39, %v272_v12 }
  0x92   :  { %333 = vst.msk [vmem:[#allocation5 + $0x30] sm:$0xff] %vm45_vm0, %v317_v38  ;;  %v300_v48 = vmul.f32 %v283_v39, %v274_v14  ;;  %335 = vst.msk [vmem:[#allocation5 + $0x40] sm:$0xff] %vm45_vm0, %v319_v9  ;;  %v312_v51 = vadd.f32 %v309_v44, %v286_v60  ;;  %v314_v52 = vadd.f32 %v309_v44, %v288_v42 }
  0x93   :  { %337 = vst.msk [vmem:[#allocation5 + $0x50] sm:$0xff] %vm45_vm0, %v321_v40  ;;  %339 = vst.msk [vmem:[#allocation5 + $0x60] sm:$0xff] %vm45_vm0, %v323_v13  ;;  %v316_v53 = vadd.f32 %v309_v44, %v290_v62  ;;  %v318_v58 = vadd.f32 %v309_v44, %v292_v43  ;;  %v320_v7 = vadd.f32 %v309_v44, %v294_v45 }
  0x94   :  { %341 = vst.msk [vmem:[#allocation5 + $0x70] sm:$0xff] %vm45_vm0, %v325_v41  ;;  %v322_v8 = vadd.f32 %v309_v44, %v296_v46  ;;  %v324_v61 = vadd.f32 %v309_v44, %v298_v47  ;;  %v326_v15 = vadd.f32 %v309_v44, %v300_v48  ;;  %328 = vst.msk [vmem:[#allocation5 + $0x8] sm:$0xff] %vm45_vm0, %v312_v51 }
  0x95   :  { %330 = vst.msk [vmem:[#allocation5 + $0x18] sm:$0xff] %vm45_vm0, %v314_v52  ;;  %332 = vst.msk [vmem:[#allocation5 + $0x28] sm:$0xff] %vm45_vm0, %v316_v53 }
  0x96   :  { %334 = vst.msk [vmem:[#allocation5 + $0x38] sm:$0xff] %vm45_vm0, %v318_v58  ;;  %336 = vst.msk [vmem:[#allocation5 + $0x48] sm:$0xff] %vm45_vm0, %v320_v7 }
  0x97   :  { %338 = vst.msk [vmem:[#allocation5 + $0x58] sm:$0xff] %vm45_vm0, %v322_v8  ;;  %340 = vst.msk [vmem:[#allocation5 + $0x68] sm:$0xff] %vm45_vm0, %v324_v61 }
  0x98   :  { %342 = vst.msk [vmem:[#allocation5 + $0x78] sm:$0xff] %vm45_vm0, %v326_v15 }
  0x99   :  { %414 = shalt.err (!%p411_p9)
}
  0x9a   :  { %354 = dma.vmem_to_hbm [thread:$0]  %s349_s2, 2048, %s671_s3, [#allocation4], %s428_s15, %s428_s15, %s429_s16  }
  0x9b   :  { %425 = dma.done.wait [#allocation4], 2048  }
  0x9c   :  { %426 = vsyncadd [#allocation4], 4294965248 }
  0x9d   :  { %358 = vsyncpa [#allocation3], 1 }
  0x9e   :  { %359 = vsyncpa [#allocation4], 1 }

</bundles_post_ra>
